<compile_context>
chip_gen: v6e
topology: v6e:2x2x1
jax: 0.10.0
libtpu: 0.0.40
codegen_flags: <defaults>
</compile_context>

<pallas_src>
import functools

import jax
import jax.numpy as jnp
from jax.experimental import pallas as pl


_LANE = 128     # vreg lane width (last dim)
_SUBLANE = 8    # vreg sublane width (second-to-last dim)


def _round_up(n, m):
    return ((n + m - 1) // m) * m


def _pad2d(a, rows, cols):
    r, c = a.shape
    if r == rows and c == cols:
        return a
    return jnp.pad(a, ((0, rows - r), (0, cols - c)))


def _full_spec(shape):
    nd = len(shape)
    return pl.BlockSpec(shape, lambda *_: (0,) * nd)


# ----------------------------------------------------------------------------
# Fused Pallas kernel: encoder -> reparameterize -> decoder
# ----------------------------------------------------------------------------
def _vae_fused_kernel(x_ref, eps_ref, w_ref, b_ref, enc_ref, recon_ref,
                      *, enc_specs, dec_specs, latent_pad):
    # enc_specs / dec_specs: tuples of (bias_row, w_row_offset, rows, cols),
    # all static Python ints with rows/cols multiples of (8, 128) and offsets
    # aligned, so every slice below is a lane/sublane-aligned static view.
    def run_stack(h, specs):
        n = len(specs)
        for li, (bi, r0, rows, cols) in enumerate(specs):
            w = w_ref[r0:r0 + rows, 0:cols]
            b = b_ref[bi:bi + 1, 0:cols]
            h = jnp.dot(h, w, preferred_element_type=jnp.float32) + b
            if li != n - 1:
                h = jnp.maximum(h, 0.0)
        return h

    # ---- encoder ----
    h = run_stack(x_ref[...], enc_specs)
    # Last encoder layer output is laid out [mu_slab | log_var_slab], each
    # latent_pad wide.  Store it once as a single lane-dense slab.
    enc_ref[...] = h.astype(enc_ref.dtype)

    # ---- reparameterize (fused; exp uses the EUP slot) ----
    mu = h[:, :latent_pad]
    log_var = h[:, latent_pad:]
    z = mu + eps_ref[...] * jnp.exp(0.5 * log_var)

    # ---- decoder ----
    z = run_stack(z, dec_specs)
    recon_ref[...] = z.astype(recon_ref.dtype)


# ----------------------------------------------------------------------------
# One-time parameter packing (padding to lane/sublane widths, single buffers)
# ----------------------------------------------------------------------------
def prepare_vae_params(params, input_dim, latent_dim):
    """Pads and packs all weights/biases into two buffers. Run ONCE."""
    enc, dec = params["encoder"], params["decoder"]
    n_enc, n_dec = len(enc), len(dec)

    in_pad = _round_up(input_dim, _LANE)
    latent_pad = _round_up(latent_dim, _LANE)

    w_blocks = []   # (rows, cols, padded weight)
    b_rows = []     # padded (1, cols) biases

    # --- encoder weights ---
    prev_pad = in_pad
    for li, (w, b) in enumerate(enc):
        _, N = w.shape
        if li == n_enc - 1:
            # Final encoder layer: split columns into mu / log_var halves and
            # pad each to latent_pad so the kernel splits at a lane boundary.
            assert N == 2 * latent_dim
            w_mu, w_lv = w[:, :latent_dim], w[:, latent_dim:]
            b_mu, b_lv = b[:latent_dim], b[latent_dim:]
            w_pad = jnp.concatenate(
                [_pad2d(w_mu, prev_pad, latent_pad),
                 _pad2d(w_lv, prev_pad, latent_pad)], axis=1)
            b_pad = jnp.concatenate(
                [_pad2d(b_mu.reshape(1, -1), 1, latent_pad),
                 _pad2d(b_lv.reshape(1, -1), 1, latent_pad)], axis=1)
            out_pad = 2 * latent_pad
        else:
            out_pad = _round_up(N, _LANE)
            w_pad = _pad2d(w, prev_pad, out_pad)
            b_pad = _pad2d(b.reshape(1, -1), 1, out_pad)
        w_blocks.append((prev_pad, out_pad, w_pad))
        b_rows.append(b_pad)
        prev_pad = out_pad

    # --- decoder weights ---
    prev_pad = latent_pad
    for (w, b) in dec:
        _, N = w.shape
        out_pad = _round_up(N, _LANE)
        w_blocks.append((prev_pad, out_pad, _pad2d(w, prev_pad, out_pad)))
        b_rows.append(_pad2d(b.reshape(1, -1), 1, out_pad))
        prev_pad = out_pad
    recon_pad = prev_pad

    # Robustness: the final un-pad slice assumes the decoder maps back to
    # input_dim (true for this module's construction).
    assert dec[-1][0].shape[1] == input_dim, "decoder output dim != input dim"

    max_cols = max(c for (_, c, _) in w_blocks)

    # Pack weights row-wise into one buffer; record static per-layer slices.
    packed_w_parts, enc_specs, dec_specs = [], [], []
    row_off = 0
    for li, (rows, cols, w_pad) in enumerate(w_blocks):
        packed_w_parts.append(_pad2d(w_pad, rows, max_cols))
        spec = (li, row_off, rows, cols)
        (enc_specs if li < n_enc else dec_specs).append(spec)
        row_off += rows
    w_packed = jnp.concatenate(packed_w_parts, axis=0)

    # Pack biases: one row per layer, padded to a sublane multiple.
    b_packed = jnp.concatenate([_pad2d(r, 1, max_cols) for r in b_rows], axis=0)
    b_packed = _pad2d(b_packed, _round_up(n_enc + n_dec, _SUBLANE), max_cols)

    meta = dict(
        enc_specs=tuple(enc_specs),
        dec_specs=tuple(dec_specs),
        latent_pad=latent_pad,
        in_pad=in_pad,
        recon_pad=recon_pad,
        input_dim=input_dim,
        latent_dim=latent_dim,
    )
    return w_packed, b_packed, meta


# ----------------------------------------------------------------------------
# Jitted forward: pad x/eps, one fused pallas_call, un-pad outputs (all fused)
# ----------------------------------------------------------------------------
def make_vae_forward(meta):
    enc_specs = meta["enc_specs"]
    dec_specs = meta["dec_specs"]
    latent_pad = meta["latent_pad"]
    in_pad = meta["in_pad"]
    recon_pad = meta["recon_pad"]
    input_dim = meta["input_dim"]
    latent_dim = meta["latent_dim"]

    kernel = functools.partial(
        _vae_fused_kernel,
        enc_specs=enc_specs, dec_specs=dec_specs, latent_pad=latent_pad)

    @jax.jit
    def forward(w_packed, b_packed, x, eps):
        M = x.shape[0]
        M_pad = _round_up(M, _SUBLANE)
        x_pad = _pad2d(x, M_pad, in_pad)
        eps_pad = _pad2d(eps, M_pad, latent_pad)

        out_shape = (
            jax.ShapeDtypeStruct((M_pad, 2 * latent_pad), x.dtype),  # [mu|lv]
            jax.ShapeDtypeStruct((M_pad, recon_pad), x.dtype),        # recon
        )
        enc_out, recon_p = pl.pallas_call(
            kernel,
            out_shape=out_shape,
            in_specs=[_full_spec(x_pad.shape), _full_spec(eps_pad.shape),
                      _full_spec(w_packed.shape), _full_spec(b_packed.shape)],
            out_specs=tuple(_full_spec(s.shape) for s in out_shape),
        )(x_pad, eps_pad, w_packed, b_packed)

        mu = enc_out[:M, :latent_dim]
        log_var = enc_out[:M, latent_pad:latent_pad + latent_dim]
        recon = recon_p[:M, :input_dim]
        return mu, log_var, recon

    return forward


# ----------------------------------------------------------------------------
# Parameter init (torch-like uniform(-1/sqrt(fan_in), 1/sqrt(fan_in)))
# ----------------------------------------------------------------------------
def init_linear_params(key, in_dim, out_dim, dtype=jnp.float32):
    kw, kb = jax.random.split(key)
    bound = 1.0 / jnp.sqrt(jnp.asarray(in_dim, dtype))
    w = jax.random.uniform(kw, (in_dim, out_dim), dtype, -bound, bound)
    b = jax.random.uniform(kb, (out_dim,), dtype, -bound, bound)
    return w, b


def init_vae_params(key, input_dim, latent_dim, enc_hidden_dims, dec_hidden_dims):
    enc_dims = [input_dim] + list(enc_hidden_dims) + [2 * latent_dim]
    dec_dims = [latent_dim] + list(dec_hidden_dims) + [input_dim]

    params = {"encoder": [], "decoder": []}
    keys = jax.random.split(key, len(enc_dims) - 1 + len(dec_dims) - 1)
    k_idx = 0
    for i in range(len(enc_dims) - 1):
        params["encoder"].append(
            init_linear_params(keys[k_idx], enc_dims[i], enc_dims[i + 1]))
        k_idx += 1
    for i in range(len(dec_dims) - 1):
        params["decoder"].append(
            init_linear_params(keys[k_idx], dec_dims[i], dec_dims[i + 1]))
        k_idx += 1
    return params


# ----------------------------------------------------------------------------
# Main
# ----------------------------------------------------------------------------
if __name__ == "__main__":
    batch = 8
    input_dim = 32
    latent_dim = 8
    enc_hidden_dims = [64, 32]
    dec_hidden_dims = [32, 64]

    key = jax.random.PRNGKey(0)
    k_params, k_x, k_eps = jax.random.split(key, 3)

    params = init_vae_params(
        k_params, input_dim, latent_dim, enc_hidden_dims, dec_hidden_dims)
    x = jax.random.normal(k_x, (batch, input_dim), dtype=jnp.float32)
    # eps plays the role of torch.randn_like(log_var) in reparameterize().
    eps = jax.random.normal(k_eps, (batch, latent_dim), dtype=jnp.float32)

    # One-time packing + jitted forward builder.
    w_packed, b_packed, meta = prepare_vae_params(params, input_dim, latent_dim)
    w_packed, b_packed = jax.block_until_ready((w_packed, b_packed))
    vae_forward = make_vae_forward(meta)

    mu, log_var, recon = vae_forward(w_packed, b_packed, x, eps)
    jax.block_until_ready((mu, log_var, recon))

    # Sanity: shapes must match the PyTorch module's forward outputs.
    assert mu.shape == (batch, latent_dim)
    assert log_var.shape == (batch, latent_dim)
    assert recon.shape == (batch, input_dim)

    # Cross-check against a pure-JAX reference of the same math.
    def ref_forward(params, x, eps):
        h = x
        for li, (w, b) in enumerate(params["encoder"]):
            h = h @ w + b
            if li != len(params["encoder"]) - 1:
                h = jnp.maximum(h, 0.0)
        mu_r, lv_r = jnp.split(h, 2, axis=1)
        z = mu_r + eps * jnp.exp(0.5 * lv_r)
        for li, (w, b) in enumerate(params["decoder"]):
            z = z @ w + b
            if li != len(params["decoder"]) - 1:
                z = jnp.maximum(z, 0.0)
        return mu_r, lv_r, z

    mu_r, lv_r, recon_r = ref_forward(params, x, eps)
    assert jnp.allclose(mu, mu_r, atol=1e-5, rtol=1e-5)
    assert jnp.allclose(log_var, lv_r, atol=1e-5, rtol=1e-5)
    assert jnp.allclose(recon, recon_r, atol=1e-5, rtol=1e-5)

    print("KERNEL_OK")
</pallas_src>

<mosaic_0001>
module attributes {stable_mosaic.version = 11 : i64} {
  func.func @_vae_fused_kernel(%arg0: memref<8x128xf32, #tpu.memory_space<vmem>>, %arg1: memref<8x128xf32, #tpu.memory_space<vmem>>, %arg2: memref<768x256xf32, #tpu.memory_space<vmem>>, %arg3: memref<8x256xf32, #tpu.memory_space<vmem>>, %arg4: memref<8x256xf32, #tpu.memory_space<vmem>>, %arg5: memref<8x128xf32, #tpu.memory_space<vmem>>) attributes {dimension_semantics = [], scalar_prefetch = 0 : i64, scratch_operands = 0 : i64, tpu.core_type = #tpu.core_type<tc>} {
    %c0 = arith.constant 0 : index
    %c0_0 = arith.constant 0 : index
    %0 = vector.load %arg0[%c0, %c0_0] : memref<8x128xf32, #tpu.memory_space<vmem>>, vector<8x128xf32>
    %c0_1 = arith.constant 0 : index
    %c0_2 = arith.constant 0 : index
    %1 = vector.load %arg2[%c0_1, %c0_2] : memref<768x256xf32, #tpu.memory_space<vmem>>, vector<128x128xf32>
    %c0_3 = arith.constant 0 : index
    %c0_4 = arith.constant 0 : index
    %2 = vector.load %arg3[%c0_3, %c0_4] : memref<8x256xf32, #tpu.memory_space<vmem>>, vector<1x128xf32>
    %cst = arith.constant dense<0.000000e+00> : vector<8x128xf32>
    %3 = tpu.matmul %0, %1, %cst {dimension_numbers = #tpu.dot_dimension_numbers<[1], [0], [0], [1], [0, 0, 1, 1], [], []>} : vector<8x128xf32>, vector<128x128xf32>, vector<8x128xf32> -> vector<8x128xf32>
    %4 = vector.broadcast %2 : vector<1x128xf32> to vector<8x128xf32>
    %5 = arith.addf %3, %4 : vector<8x128xf32>
    %cst_5 = arith.constant 0.000000e+00 : f32
    %6 = vector.broadcast %cst_5 : f32 to vector<8x128xf32>
    %7 = arith.maximumf %5, %6 : vector<8x128xf32>
    %c128 = arith.constant 128 : index
    %c0_6 = arith.constant 0 : index
    %8 = vector.load %arg2[%c128, %c0_6] : memref<768x256xf32, #tpu.memory_space<vmem>>, vector<128x128xf32>
    %c1 = arith.constant 1 : index
    %c0_7 = arith.constant 0 : index
    %9 = vector.load %arg3[%c1, %c0_7] : memref<8x256xf32, #tpu.memory_space<vmem>>, vector<1x128xf32>
    %cst_8 = arith.constant dense<0.000000e+00> : vector<8x128xf32>
    %10 = tpu.matmul %7, %8, %cst_8 {dimension_numbers = #tpu.dot_dimension_numbers<[1], [0], [0], [1], [0, 0, 1, 1], [], []>} : vector<8x128xf32>, vector<128x128xf32>, vector<8x128xf32> -> vector<8x128xf32>
    %11 = vector.broadcast %9 : vector<1x128xf32> to vector<8x128xf32>
    %12 = arith.addf %10, %11 : vector<8x128xf32>
    %cst_9 = arith.constant 0.000000e+00 : f32
    %13 = vector.broadcast %cst_9 : f32 to vector<8x128xf32>
    %14 = arith.maximumf %12, %13 : vector<8x128xf32>
    %c256 = arith.constant 256 : index
    %c0_10 = arith.constant 0 : index
    %15 = vector.load %arg2[%c256, %c0_10] : memref<768x256xf32, #tpu.memory_space<vmem>>, vector<128x256xf32>
    %c2 = arith.constant 2 : index
    %c0_11 = arith.constant 0 : index
    %16 = vector.load %arg3[%c2, %c0_11] : memref<8x256xf32, #tpu.memory_space<vmem>>, vector<1x256xf32>
    %cst_12 = arith.constant dense<0.000000e+00> : vector<8x256xf32>
    %17 = tpu.matmul %14, %15, %cst_12 {dimension_numbers = #tpu.dot_dimension_numbers<[1], [0], [0], [1], [0, 0, 1, 1], [], []>} : vector<8x128xf32>, vector<128x256xf32>, vector<8x256xf32> -> vector<8x256xf32>
    %18 = vector.broadcast %16 : vector<1x256xf32> to vector<8x256xf32>
    %19 = arith.addf %17, %18 : vector<8x256xf32>
    %c0_13 = arith.constant 0 : index
    %c0_14 = arith.constant 0 : index
    %20 = vector.load %arg4[%c0_13, %c0_14] : memref<8x256xf32, #tpu.memory_space<vmem>>, vector<8x256xf32>
    tpu.vector_store %arg4[%c0_13, %c0_14], %19 {strides = array<i32>} : memref<8x256xf32, #tpu.memory_space<vmem>>, vector<8x256xf32>,
    %21 = vector.extract_strided_slice %19 {offsets = [0, 0], sizes = [8, 128], strides = [1, 1]} : vector<8x256xf32> to vector<8x128xf32>
    %22 = vector.extract_strided_slice %19 {offsets = [0, 128], sizes = [8, 128], strides = [1, 1]} : vector<8x256xf32> to vector<8x128xf32>
    %c0_15 = arith.constant 0 : index
    %c0_16 = arith.constant 0 : index
    %23 = vector.load %arg1[%c0_15, %c0_16] : memref<8x128xf32, #tpu.memory_space<vmem>>, vector<8x128xf32>
    %cst_17 = arith.constant 5.000000e-01 : f32
    %24 = vector.broadcast %cst_17 : f32 to vector<8x128xf32>
    %25 = arith.mulf %24, %22 : vector<8x128xf32>
    %26 = math.exp %25 : vector<8x128xf32>
    %27 = arith.mulf %23, %26 : vector<8x128xf32>
    %28 = arith.addf %21, %27 : vector<8x128xf32>
    %c384 = arith.constant 384 : index
    %c0_18 = arith.constant 0 : index
    %29 = vector.load %arg2[%c384, %c0_18] : memref<768x256xf32, #tpu.memory_space<vmem>>, vector<128x128xf32>
    %c3 = arith.constant 3 : index
    %c0_19 = arith.constant 0 : index
    %30 = vector.load %arg3[%c3, %c0_19] : memref<8x256xf32, #tpu.memory_space<vmem>>, vector<1x128xf32>
    %cst_20 = arith.constant dense<0.000000e+00> : vector<8x128xf32>
    %31 = tpu.matmul %28, %29, %cst_20 {dimension_numbers = #tpu.dot_dimension_numbers<[1], [0], [0], [1], [0, 0, 1, 1], [], []>} : vector<8x128xf32>, vector<128x128xf32>, vector<8x128xf32> -> vector<8x128xf32>
    %32 = vector.broadcast %30 : vector<1x128xf32> to vector<8x128xf32>
    %33 = arith.addf %31, %32 : vector<8x128xf32>
    %cst_21 = arith.constant 0.000000e+00 : f32
    %34 = vector.broadcast %cst_21 : f32 to vector<8x128xf32>
    %35 = arith.maximumf %33, %34 : vector<8x128xf32>
    %c512 = arith.constant 512 : index
    %c0_22 = arith.constant 0 : index
    %36 = vector.load %arg2[%c512, %c0_22] : memref<768x256xf32, #tpu.memory_space<vmem>>, vector<128x128xf32>
    %c4 = arith.constant 4 : index
    %c0_23 = arith.constant 0 : index
    %37 = vector.load %arg3[%c4, %c0_23] : memref<8x256xf32, #tpu.memory_space<vmem>>, vector<1x128xf32>
    %cst_24 = arith.constant dense<0.000000e+00> : vector<8x128xf32>
    %38 = tpu.matmul %35, %36, %cst_24 {dimension_numbers = #tpu.dot_dimension_numbers<[1], [0], [0], [1], [0, 0, 1, 1], [], []>} : vector<8x128xf32>, vector<128x128xf32>, vector<8x128xf32> -> vector<8x128xf32>
    %39 = vector.broadcast %37 : vector<1x128xf32> to vector<8x128xf32>
    %40 = arith.addf %38, %39 : vector<8x128xf32>
    %cst_25 = arith.constant 0.000000e+00 : f32
    %41 = vector.broadcast %cst_25 : f32 to vector<8x128xf32>
    %42 = arith.maximumf %40, %41 : vector<8x128xf32>
    %c640 = arith.constant 640 : index
    %c0_26 = arith.constant 0 : index
    %43 = vector.load %arg2[%c640, %c0_26] : memref<768x256xf32, #tpu.memory_space<vmem>>, vector<128x128xf32>
    %c5 = arith.constant 5 : index
    %c0_27 = arith.constant 0 : index
    %44 = vector.load %arg3[%c5, %c0_27] : memref<8x256xf32, #tpu.memory_space<vmem>>, vector<1x128xf32>
    %cst_28 = arith.constant dense<0.000000e+00> : vector<8x128xf32>
    %45 = tpu.matmul %42, %43, %cst_28 {dimension_numbers = #tpu.dot_dimension_numbers<[1], [0], [0], [1], [0, 0, 1, 1], [], []>} : vector<8x128xf32>, vector<128x128xf32>, vector<8x128xf32> -> vector<8x128xf32>
    %46 = vector.broadcast %44 : vector<1x128xf32> to vector<8x128xf32>
    %47 = arith.addf %45, %46 : vector<8x128xf32>
    %c0_29 = arith.constant 0 : index
    %c0_30 = arith.constant 0 : index
    %48 = vector.load %arg5[%c0_29, %c0_30] : memref<8x128xf32, #tpu.memory_space<vmem>>, vector<8x128xf32>
    tpu.vector_store %arg5[%c0_29, %c0_30], %47 {strides = array<i32>} : memref<8x128xf32, #tpu.memory_space<vmem>>, vector<8x128xf32>,
    return
  }
}

</mosaic_0001>

<bundles_post_ra>
// kernel: forward.1
= control target key start
LH: loop header
LB: loop body
LE: loop exit
PB: predicated region body
PF: predicated region fallthrough
CT: control target
= control target key end

     0   :  { %11 = vsyncpa [#allocation3], 0  ;;  %s1094_s0 = inlined_call_operand.vmem [shape: f32[8,128], index: 0, kind: input, shape index: {}]   ;;  %s1095_s1 = inlined_call_operand.vmem [shape: f32[8,128], index: 1, kind: input, shape index: {}]   ;;  %s1096_s2 = inlined_call_operand.hbm [shape: f32[768,256], index: 2, kind: input, shape index: {}]   ;;  %s1097_s3 = inlined_call_operand.vmem [shape: f32[8,256], index: 3, kind: input, shape index: {}]   ;;  %s1098_s4 = inlined_call_operand.vmem [shape: f32[8,256], index: 4, kind: output, shape index: {0}]   ;;  %s1099_s5 = inlined_call_operand.hbm [shape: f32[8,128], index: 5, kind: output, shape index: {1}]  }
   0x1   :  { %12 = vsyncpa [#allocation4], 0  ;;  %s931_s18 = smov [#allocation2]  }
   0x2   :  { %s22_s19 = sshll.u32 %s931_s18, 4  ;;  %s23_s19 = int_to_ptr.vmem [resolvable:$true] %s22_s19 }
   0x3   :  { %s895_s20 = scalar_lea.vmem %s23_s19, 24576  ;;  %p900_p1 = scmp.lt.s32.totalorder %s23_s19, %s23_s19 }
   0x4   :  { %p896_p0 = scmp.ne.s32.totalorder %s23_s19, %s895_s20  ;;  %p901_p2 = scmp.lt.s32.totalorder %s895_s20, %s895_s20 }
   0x6   :  { %p902_p3 = por %p901_p2, %p900_p1 }
   0x8   :  { %p903_p4 = pnand %p902_p3, %p896_p0 }
   0xa   :  { %906 = shalt.err (!%p903_p4)
}
   0xb   :  { %s932_s21 = smov 256   ;;  %s933_s22 = smov 16  }
   0xc   :  { %28 = dma.hbm_to_vmem [thread:$0]  %s1096_s2, 24576, %s23_s19, [#allocation3], %s932_s21, %s932_s21, %s933_s22  }
   0xd   :  { %927 = dma.done.wait [#allocation3], 24576  }
   0xe   :  { %928 = vsyncadd [#allocation3], 4294942720  ;;  %v934_v0 = vmov 0.0   ;;  %vm935_vm0 = vmmov 0   ;;  %v50_v1 = vld [vmem:[#allocation2 + $0xf0] sm:$0xff]  ;;  %v49_v2 = vld [vmem:[#allocation2 + $0xe0] sm:$0xff] }
   0xf   :  { %704 = vmatprep.subr.mxu0 %v934_v0  ;;  %736 = vmatprep.mubr.msk.f32.mxu0 %vm935_vm0, %v934_v0  ;;  %v48_v3 = vld [vmem:[#allocation2 + $0xd0] sm:$0xff]  ;;  %v47_v4 = vld [vmem:[#allocation2 + $0xc0] sm:$0xff]  ;;  %v242_v34 = vld [vmem:[#allocation2 + $0x2f8] sm:$0xff]  ;;  %s936_s16 = smov [#allocation5]  }
  0x10   :  { %739 = vmatprep.subr.mxu1 %v934_v0  ;;  %771 = vmatprep.mubr.msk.f32.mxu1 %vm935_vm0, %v934_v0  ;;  %v138_v5 = vld [vmem:[#allocation2 + $0x1f0] sm:$0xff]  ;;  %v137_v7 = vld [vmem:[#allocation2 + $0x1e0] sm:$0xff]  ;;  %v240_v36 = vld [vmem:[#allocation2 + $0x2e8] sm:$0xff]  ;;  %s607_s17 = sshll.u32 %s936_s16, 4  ;;  %s608_s17 = int_to_ptr.vmem [resolvable:$true] %s607_s17 }
  0x11   :  { %705 = vmatpush3.msra.mxu0 %v50_v1  ;;  %v46_v6 = vld [vmem:[#allocation2 + $0xb0] sm:$0xff]  ;;  %740 = vmatpush3.msra.mxu1 %v138_v5  ;;  %v45_v9 = vld [vmem:[#allocation2 + $0xa0] sm:$0xff]  ;;  %v238_v38 = vld [vmem:[#allocation2 + $0x2d8] sm:$0xff]  ;;  %s907_s18 = scalar_lea.vmem %s608_s17, 128  ;;  %p912_p6 = scmp.lt.s32.totalorder %s608_s17, %s608_s17 }
  0x12   :  { %706 = vmatprep.subr.mxu0 %v934_v0  ;;  %741 = vmatprep.subr.mxu1 %v934_v0  ;;  %v136_v8 = vld [vmem:[#allocation2 + $0x1d0] sm:$0xff]  ;;  %v135_v10 = vld [vmem:[#allocation2 + $0x1c0] sm:$0xff]  ;;  %v236_v40 = vld [vmem:[#allocation2 + $0x2c8] sm:$0xff]  ;;  %p908_p5 = scmp.ne.s32.totalorder %s608_s17, %s907_s18  ;;  %p913_p7 = scmp.lt.s32.totalorder %s907_s18, %s907_s18 }
  0x13   :  { %707 = vmatpush3.msra.mxu0 %v49_v2  ;;  %742 = vmatpush3.msra.mxu1 %v137_v7  ;;  %v44_v11 = vld [vmem:[#allocation2 + $0x90] sm:$0xff]  ;;  %v43_v13 = vld [vmem:[#allocation2 + $0x80] sm:$0xff]  ;;  %v234_v42 = vld [vmem:[#allocation2 + $0x2b8] sm:$0xff] }
  0x14   :  { %708 = vmatprep.subr.mxu0 %v934_v0  ;;  %743 = vmatprep.subr.mxu1 %v934_v0  ;;  %v134_v12 = vld [vmem:[#allocation2 + $0x1b0] sm:$0xff]  ;;  %v133_v14 = vld [vmem:[#allocation2 + $0x1a0] sm:$0xff]  ;;  %v232_v44 = vld [vmem:[#allocation2 + $0x2a8] sm:$0xff]  ;;  %p914_p8 = por %p913_p7, %p912_p6 }
  0x15   :  { %709 = vmatpush3.msra.mxu0 %v48_v3  ;;  %744 = vmatpush3.msra.mxu1 %v136_v8  ;;  %v42_v15 = vld [vmem:[#allocation2 + $0x70] sm:$0xff]  ;;  %v41_v17 = vld [vmem:[#allocation2 + $0x60] sm:$0xff]  ;;  %v230_v46 = vld [vmem:[#allocation2 + $0x298] sm:$0xff] }
  0x16   :  { %710 = vmatprep.subr.mxu0 %v934_v0  ;;  %745 = vmatprep.subr.mxu1 %v934_v0  ;;  %v132_v16 = vld [vmem:[#allocation2 + $0x190] sm:$0xff]  ;;  %v131_v18 = vld [vmem:[#allocation2 + $0x180] sm:$0xff]  ;;  %v228_v48 = vld [vmem:[#allocation2 + $0x288] sm:$0xff]  ;;  %p915_p9 = pnand %p914_p8, %p908_p5 }
  0x17   :  { %711 = vmatpush3.msra.mxu0 %v47_v4  ;;  %746 = vmatpush3.msra.mxu1 %v135_v10  ;;  %v40_v19 = vld [vmem:[#allocation2 + $0x50] sm:$0xff]  ;;  %v39_v21 = vld [vmem:[#allocation2 + $0x40] sm:$0xff]  ;;  %v226_v50 = vld [vmem:[#allocation2 + $0x278] sm:$0xff] }
  0x18   :  { %712 = vmatprep.subr.mxu0 %v934_v0  ;;  %747 = vmatprep.subr.mxu1 %v934_v0  ;;  %v130_v20 = vld [vmem:[#allocation2 + $0x170] sm:$0xff]  ;;  %v129_v22 = vld [vmem:[#allocation2 + $0x160] sm:$0xff]  ;;  %v224_v52 = vld [vmem:[#allocation2 + $0x268] sm:$0xff] }
  0x19   :  { %713 = vmatpush3.msra.mxu0 %v46_v6  ;;  %748 = vmatpush3.msra.mxu1 %v134_v12  ;;  %v38_v23 = vld [vmem:[#allocation2 + $0x30] sm:$0xff]  ;;  %v37_v25 = vld [vmem:[#allocation2 + $0x20] sm:$0xff]  ;;  %v222_v54 = vld [vmem:[#allocation2 + $0x258] sm:$0xff] }
  0x1a   :  { %714 = vmatprep.subr.mxu0 %v934_v0  ;;  %749 = vmatprep.subr.mxu1 %v934_v0  ;;  %v128_v24 = vld [vmem:[#allocation2 + $0x150] sm:$0xff]  ;;  %v127_v26 = vld [vmem:[#allocation2 + $0x140] sm:$0xff]  ;;  %v220_v56 = vld [vmem:[#allocation2 + $0x248] sm:$0xff] }
  0x1b   :  { %715 = vmatpush3.msra.mxu0 %v45_v9  ;;  %750 = vmatpush3.msra.mxu1 %v133_v14  ;;  %v36_v27 = vld [vmem:[#allocation2 + $0x10] sm:$0xff]  ;;  %v35_v29 = vld [vmem:[#allocation2] sm:$0xff]  ;;  %v218_v58 = vld [vmem:[#allocation2 + $0x238] sm:$0xff] }
  0x1c   :  { %716 = vmatprep.subr.mxu0 %v934_v0  ;;  %751 = vmatprep.subr.mxu1 %v934_v0  ;;  %v126_v28 = vld [vmem:[#allocation2 + $0x130] sm:$0xff]  ;;  %v34_v30 = vld [vmem:[%s1094_s0] sm:$0xff]  ;;  %v216_v60 = vld [vmem:[#allocation2 + $0x228] sm:$0xff] }
  0x1d   :  { %717 = vmatpush3.msra.mxu0 %v44_v11  ;;  %752 = vmatpush3.msra.mxu1 %v132_v16  ;;  %v125_v31 = vld [vmem:[#allocation2 + $0x120] sm:$0xff]  ;;  %v124_v32 = vld [vmem:[#allocation2 + $0x110] sm:$0xff]  ;;  %v214_v4 = vld [vmem:[#allocation2 + $0x218] sm:$0xff] }
  0x1e   :  { %718 = vmatprep.subr.mxu0 %v934_v0  ;;  %753 = vmatprep.subr.mxu1 %v934_v0  ;;  %v123_v33 = vld [vmem:[#allocation2 + $0x100] sm:$0xff]  ;;  %v241_v35 = vld [vmem:[#allocation2 + $0x2f0] sm:$0xff]  ;;  %v212_v6 = vld [vmem:[#allocation2 + $0x208] sm:$0xff] }
  0x1f   :  { %719 = vmatpush3.msra.mxu0 %v43_v13  ;;  %754 = vmatpush3.msra.mxu1 %v131_v18  ;;  %v239_v37 = vld [vmem:[#allocation2 + $0x2e0] sm:$0xff]  ;;  %v237_v39 = vld [vmem:[#allocation2 + $0x2d0] sm:$0xff] }
  0x20   :  { %720 = vmatprep.subr.mxu0 %v934_v0  ;;  %755 = vmatprep.subr.mxu1 %v934_v0  ;;  %v235_v41 = vld [vmem:[#allocation2 + $0x2c0] sm:$0xff]  ;;  %v233_v43 = vld [vmem:[#allocation2 + $0x2b0] sm:$0xff] }
  0x21   :  { %721 = vmatpush3.msra.mxu0 %v42_v15  ;;  %756 = vmatpush3.msra.mxu1 %v130_v20  ;;  %v231_v45 = vld [vmem:[#allocation2 + $0x2a0] sm:$0xff]  ;;  %v229_v47 = vld [vmem:[#allocation2 + $0x290] sm:$0xff] }
  0x22   :  { %722 = vmatprep.subr.mxu0 %v934_v0  ;;  %757 = vmatprep.subr.mxu1 %v934_v0  ;;  %v227_v49 = vld [vmem:[#allocation2 + $0x280] sm:$0xff]  ;;  %v225_v51 = vld [vmem:[#allocation2 + $0x270] sm:$0xff] }
  0x23   :  { %723 = vmatpush3.msra.mxu0 %v41_v17  ;;  %758 = vmatpush3.msra.mxu1 %v129_v22  ;;  %v223_v53 = vld [vmem:[#allocation2 + $0x260] sm:$0xff]  ;;  %v221_v55 = vld [vmem:[#allocation2 + $0x250] sm:$0xff] }
  0x24   :  { %724 = vmatprep.subr.mxu0 %v934_v0  ;;  %759 = vmatprep.subr.mxu1 %v934_v0  ;;  %v219_v57 = vld [vmem:[#allocation2 + $0x240] sm:$0xff]  ;;  %v217_v59 = vld [vmem:[#allocation2 + $0x230] sm:$0xff] }
  0x25   :  { %725 = vmatpush3.msra.mxu0 %v40_v19  ;;  %760 = vmatpush3.msra.mxu1 %v128_v24  ;;  %v51_v61 = vld [vmem:[%s1097_s3] ss:$0 sm:$0xff]  ;;  %v213_v5 = vld [vmem:[#allocation2 + $0x210] sm:$0xff]  ;;  %v139_v10 = vld [vmem:[%s1097_s3 + $0x1] ss:$0 sm:$0xff] }
  0x26   :  { %726 = vmatprep.subr.mxu0 %v934_v0  ;;  %761 = vmatprep.subr.mxu1 %v934_v0  ;;  %v215_v3 = vld [vmem:[#allocation2 + $0x220] sm:$0xff]  ;;  %v350_v8 = vld [vmem:[#allocation2 + $0x3f0] sm:$0xff] }
  0x27   :  { %727 = vmatpush3.msra.mxu0 %v39_v21  ;;  %762 = vmatpush3.msra.mxu1 %v127_v26  ;;  %v211_v7 = vld [vmem:[#allocation2 + $0x200] sm:$0xff]  ;;  %v348_v15 = vld [vmem:[#allocation2 + $0x3d0] sm:$0xff] }
  0x28   :  { %728 = vmatprep.subr.mxu0 %v934_v0  ;;  %763 = vmatprep.subr.mxu1 %v934_v0  ;;  %v349_v9 = vld [vmem:[#allocation2 + $0x3e0] sm:$0xff]  ;;  %v346_v17 = vld [vmem:[#allocation2 + $0x3b0] sm:$0xff] }
  0x29   :  { %729 = vmatpush3.msra.mxu0 %v38_v23  ;;  %764 = vmatpush3.msra.mxu1 %v126_v28  ;;  %v347_v16 = vld [vmem:[#allocation2 + $0x3c0] sm:$0xff]  ;;  %v344_v19 = vld [vmem:[#allocation2 + $0x390] sm:$0xff] }
  0x2a   :  { %730 = vmatprep.subr.mxu0 %v934_v0  ;;  %765 = vmatprep.subr.mxu1 %v934_v0  ;;  %v345_v18 = vld [vmem:[#allocation2 + $0x3a0] sm:$0xff]  ;;  %v342_v21 = vld [vmem:[#allocation2 + $0x370] sm:$0xff] }
  0x2b   :  { %731 = vmatpush3.msra.mxu0 %v37_v25  ;;  %766 = vmatpush3.msra.mxu1 %v125_v31  ;;  %v343_v20 = vld [vmem:[#allocation2 + $0x380] sm:$0xff]  ;;  %v340_v23 = vld [vmem:[#allocation2 + $0x350] sm:$0xff] }
  0x2c   :  { %732 = vmatprep.subr.mxu0 %v934_v0  ;;  %767 = vmatprep.subr.mxu1 %v934_v0  ;;  %v341_v22 = vld [vmem:[#allocation2 + $0x360] sm:$0xff]  ;;  %v338_v25 = vld [vmem:[#allocation2 + $0x330] sm:$0xff] }
  0x2d   :  { %733 = vmatpush3.msra.mxu0 %v36_v27  ;;  %768 = vmatpush3.msra.mxu1 %v124_v32  ;;  %v339_v24 = vld [vmem:[#allocation2 + $0x340] sm:$0xff]  ;;  %v336_v27 = vld [vmem:[#allocation2 + $0x310] sm:$0xff] }
  0x2e   :  { %734 = vmatprep.subr.mxu0 %v934_v0  ;;  %769 = vmatprep.subr.mxu1 %v934_v0  ;;  %v337_v26 = vld [vmem:[#allocation2 + $0x320] sm:$0xff]  ;;  %v436_v31 = vld [vmem:[#allocation2 + $0x4d0] sm:$0xff] }
  0x2f   :  { %735 = vmatpush3.msra.mxu0 %v35_v29  ;;  %770 = vmatpush3.msra.mxu1 %v123_v33  ;;  %v335_v28 = vld [vmem:[#allocation2 + $0x300] sm:$0xff]  ;;  %v438_v29 = vld [vmem:[#allocation2 + $0x4f0] sm:$0xff] }
  0x30   :  { %737 = vmatmul.mubr.f32.vlgmr.msra.gmra.mxu0 %v34_v30  ;;  %774 = vmatprep.subr.mxu1 %v934_v0  ;;  %v437_v30 = vld [vmem:[#allocation2 + $0x4e0] sm:$0xff]  ;;  %v434_v33 = vld [vmem:[#allocation2 + $0x4b0] sm:$0xff] }
  0x31   :  { %320 = vmatprep.mubr.f32.mxu0 %v934_v0  ;;  %256 = vmatprep.subr.mxu0 %v242_v34  ;;  %v435_v32 = vld [vmem:[#allocation2 + $0x4c0] sm:$0xff] }
  0x32   :  { %257 = vmatpush1.msra.mxu0 %v241_v35  ;;  %v433_v34 = vld [vmem:[#allocation2 + $0x4a0] sm:$0xff]  ;;  %v432_v35 = vld [vmem:[#allocation2 + $0x490] sm:$0xff] }
  0x33   :  { %258 = vmatprep.subr.mxu0 %v240_v36  ;;  %v431_v36 = vld [vmem:[#allocation2 + $0x480] sm:$0xff] }
  0x34   :  { %259 = vmatpush1.msra.mxu0 %v239_v37  ;;  %v430_v37 = vld [vmem:[#allocation2 + $0x470] sm:$0xff] }
  0x35   :  { %260 = vmatprep.subr.mxu0 %v238_v38  ;;  %v429_v38 = vld [vmem:[#allocation2 + $0x460] sm:$0xff] }
  0x36   :  { %261 = vmatpush1.msra.mxu0 %v237_v39  ;;  %v428_v39 = vld [vmem:[#allocation2 + $0x450] sm:$0xff] }
  0x37   :  { %262 = vmatprep.subr.mxu0 %v236_v40  ;;  %v427_v40 = vld [vmem:[#allocation2 + $0x440] sm:$0xff] }
  0x38   :  { %263 = vmatpush1.msra.mxu0 %v235_v41  ;;  %v426_v41 = vld [vmem:[#allocation2 + $0x430] sm:$0xff] }
  0x39   :  { %264 = vmatprep.subr.mxu0 %v234_v42  ;;  %v246_v42 = vlaneseq }
  0x3a   :  { %265 = vmatpush1.msra.mxu0 %v233_v43 }
  0x3b   :  { %266 = vmatprep.subr.mxu0 %v232_v44  ;;  %v247_v43 = vshrl.u32 %v246_v42, 7 }
  0x3c   :  { %267 = vmatpush1.msra.mxu0 %v231_v45  ;;  %v618_v45 = vld [vmem:[%s1097_s3 + $0x2] ss:$8 sm:$0x3] }
  0x3d   :  { %268 = vmatprep.subr.mxu0 %v230_v46  ;;  %v248_v44 = vsub.s32 0, %v247_v43  ;;  %v252_v46 = vsub.s32 1, %v247_v43 }
  0x3e   :  { %269 = vmatpush1.msra.mxu0 %v229_v47 }
  0x3f   :  { %270 = vmatprep.subr.mxu0 %v228_v48  ;;  %v249_v47 = vrot.slane %v618_v45, %v248_v44  ;;  %v253_v48 = vrot.slane %v618_v45, %v252_v46 }
  0x40   :  { %271 = vmatpush1.msra.mxu0 %v227_v49 }
  0x41   :  { %272 = vmatprep.subr.mxu0 %v226_v50 }
  0x42   :  { %273 = vmatpush1.msra.mxu0 %v225_v51 }
  0x43   :  { %274 = vmatprep.subr.mxu0 %v224_v52 }
  0x44   :  { %275 = vmatpush1.msra.mxu0 %v223_v53 }
  0x45   :  { %276 = vmatprep.subr.mxu0 %v222_v54 }
  0x46   :  { %277 = vmatpush1.msra.mxu0 %v221_v55  ;;  %v329_v55 = vld [vmem:[%s1095_s1] sm:$0xff] }
  0x47   :  { %278 = vmatprep.subr.mxu0 %v220_v56 }
  0x48   :  { %279 = vmatpush1.msra.mxu0 %v219_v57 }
  0x49   :  { %280 = vmatprep.subr.mxu0 %v218_v58 }
  0x4a   :  { %281 = vmatpush1.msra.mxu0 %v217_v59  ;;  %v425_v59 = vld [vmem:[#allocation2 + $0x420] sm:$0xff] }
  0x4b   :  { %282 = vmatprep.subr.mxu0 %v216_v60  ;;  %v424_v60 = vld [vmem:[#allocation2 + $0x410] sm:$0xff] }
  0x4c   :  { %283 = vmatpush1.msra.mxu0 %v215_v3  ;;  %v522_v3 = vld [vmem:[#allocation2 + $0x5b0] sm:$0xff] }
  0x4d   :  { %284 = vmatprep.subr.mxu0 %v214_v4  ;;  %v521_v4 = vld [vmem:[#allocation2 + $0x5a0] sm:$0xff] }
  0x4e   :  { %285 = vmatpush1.msra.mxu0 %v213_v5  ;;  %v520_v5 = vld [vmem:[#allocation2 + $0x590] sm:$0xff] }
  0x4f   :  { %286 = vmatprep.subr.mxu0 %v212_v6  ;;  %v519_v6 = vld [vmem:[#allocation2 + $0x580] sm:$0xff] }
  0x50   :  { %287 = vmatpush1.msra.mxu0 %v211_v7  ;;  %v518_v7 = vld [vmem:[#allocation2 + $0x570] sm:$0xff] }
  0x51   :  { %809 = vmatprep.subr.mxu0 %v934_v0 }
  0xf0   :  { %v118_v62 = vpop.f32.mrf.mxu0 }
  0xf1   :  { %v119_v63 = vadd.f32 %v118_v62, %v51_v61  ;;  %v423_v61 = vld [vmem:[#allocation2 + $0x400] sm:$0xff]  ;;  %v526_v62 = vld [vmem:[#allocation2 + $0x5f0] sm:$0xff] }
  0xf2   :  { %v738_v1 = vpop.f32.mrf.mxu0 }
  0xf3   :  { %v122_v2 = vmax.f32 %v119_v63, 0.0  ;;  %v525_v63 = vld [vmem:[#allocation2 + $0x5e0] sm:$0xff]  ;;  %v524_v1 = vld [vmem:[#allocation2 + $0x5d0] sm:$0xff] }
  0xf5   :  { %772 = vmatmul.mubr.f32.vlgmr.msra.gmra.mxu1 %v122_v2  ;;  %v523_v2 = vld [vmem:[#allocation2 + $0x5c0] sm:$0xff] }
  0xf6   :  { %806 = vmatprep.mubr.msk.f32.mxu1 %vm935_vm0, %v934_v0  ;;  %775 = vmatpush3.msra.mxu1 %v350_v8  ;;  %v517_v8 = vld [vmem:[#allocation2 + $0x560] sm:$0xff] }
  0xf7   :  { %776 = vmatprep.subr.mxu1 %v934_v0 }
  0xf8   :  { %777 = vmatpush3.msra.mxu1 %v349_v9  ;;  %v516_v9 = vld [vmem:[#allocation2 + $0x550] sm:$0xff] }
  0xf9   :  { %778 = vmatprep.subr.mxu1 %v934_v0 }
  0xfa   :  { %779 = vmatpush3.msra.mxu1 %v348_v15 }
  0xfb   :  { %780 = vmatprep.subr.mxu1 %v934_v0 }
  0xfc   :  { %781 = vmatpush3.msra.mxu1 %v347_v16 }
  0xfd   :  { %782 = vmatprep.subr.mxu1 %v934_v0 }
  0xfe   :  { %783 = vmatpush3.msra.mxu1 %v346_v17  ;;  %v513_v17 = vld [vmem:[#allocation2 + $0x520] sm:$0xff] }
  0xff   :  { %784 = vmatprep.subr.mxu1 %v934_v0 }
 0x100   :  { %785 = vmatpush3.msra.mxu1 %v345_v18  ;;  %v512_v18 = vld [vmem:[#allocation2 + $0x510] sm:$0xff] }
 0x101   :  { %786 = vmatprep.subr.mxu1 %v934_v0 }
 0x102   :  { %787 = vmatpush3.msra.mxu1 %v344_v19  ;;  %v511_v19 = vld [vmem:[#allocation2 + $0x500] sm:$0xff] }
 0x103   :  { %788 = vmatprep.subr.mxu1 %v934_v0 }
 0x104   :  { %789 = vmatpush3.msra.mxu1 %v343_v20  ;;  %v439_v20 = vld [vmem:[%s1097_s3 + $0x4] ss:$0 sm:$0xff] }
 0x105   :  { %790 = vmatprep.subr.mxu1 %v934_v0 }
 0x106   :  { %791 = vmatpush3.msra.mxu1 %v342_v21 }
 0x107   :  { %792 = vmatprep.subr.mxu1 %v934_v0 }
 0x108   :  { %793 = vmatpush3.msra.mxu1 %v341_v22 }
 0x109   :  { %794 = vmatprep.subr.mxu1 %v934_v0 }
 0x10a   :  { %795 = vmatpush3.msra.mxu1 %v340_v23 }
 0x10b   :  { %796 = vmatprep.subr.mxu1 %v934_v0 }
 0x10c   :  { %797 = vmatpush3.msra.mxu1 %v339_v24 }
 0x10d   :  { %798 = vmatprep.subr.mxu1 %v934_v0 }
 0x10e   :  { %799 = vmatpush3.msra.mxu1 %v338_v25  ;;  %v527_v25 = vld [vmem:[%s1097_s3 + $0x5] ss:$0 sm:$0xff] }
 0x10f   :  { %800 = vmatprep.subr.mxu1 %v934_v0 }
 0x110   :  { %801 = vmatpush3.msra.mxu1 %v337_v26 }
 0x111   :  { %802 = vmatprep.subr.mxu1 %v934_v0 }
 0x112   :  { %803 = vmatpush3.msra.mxu1 %v336_v27 }
 0x113   :  { %804 = vmatprep.subr.mxu1 %v934_v0 }
 0x114   :  { %805 = vmatpush3.msra.mxu1 %v335_v28 }
 0x115   :  { %844 = vmatprep.subr.mxu1 %v934_v0 }
 0x1b5   :  { %v206_v11 = vpop.f32.mrf.mxu1 }
 0x1b6   :  { %v207_v12 = vadd.f32 %v206_v11, %v139_v10  ;;  %v515_v10 = vld [vmem:[#allocation2 + $0x540] sm:$0xff]  ;;  %v514_v11 = vld [vmem:[#allocation2 + $0x530] sm:$0xff] }
 0x1b7   :  { %v773_v13 = vpop.f32.mrf.mxu1 }
 0x1b8   :  { %v210_v14 = vmax.f32 %v207_v12, 0.0  ;;  %v351_v12 = vld [vmem:[%s1097_s3 + $0x3] ss:$0 sm:$0xff] }
 0x1ba   :  { %321 = vmatmul.mubr.f32.vlgmr.msra.gmra.mxu0 %v210_v14 }
 0x1bb   :  { %841 = vmatprep.mubr.msk.f32.mxu0 %vm935_vm0, %v934_v0  ;;  %810 = vmatpush3.msra.mxu0 %v438_v29 }
 0x1bc   :  { %811 = vmatprep.subr.mxu0 %v934_v0 }
 0x1bd   :  { %812 = vmatpush3.msra.mxu0 %v437_v30 }
 0x1be   :  { %813 = vmatprep.subr.mxu0 %v934_v0 }
 0x1bf   :  { %814 = vmatpush3.msra.mxu0 %v436_v31 }
 0x1c0   :  { %815 = vmatprep.subr.mxu0 %v934_v0 }
 0x1c1   :  { %816 = vmatpush3.msra.mxu0 %v435_v32 }
 0x1c2   :  { %817 = vmatprep.subr.mxu0 %v934_v0 }
 0x1c3   :  { %818 = vmatpush3.msra.mxu0 %v434_v33 }
 0x1c4   :  { %819 = vmatprep.subr.mxu0 %v934_v0 }
 0x1c5   :  { %820 = vmatpush3.msra.mxu0 %v433_v34 }
 0x1c6   :  { %821 = vmatprep.subr.mxu0 %v934_v0 }
 0x1c7   :  { %822 = vmatpush3.msra.mxu0 %v432_v35 }
 0x1c8   :  { %823 = vmatprep.subr.mxu0 %v934_v0 }
 0x1c9   :  { %824 = vmatpush3.msra.mxu0 %v431_v36 }
 0x1ca   :  { %825 = vmatprep.subr.mxu0 %v934_v0 }
 0x1cb   :  { %826 = vmatpush3.msra.mxu0 %v430_v37 }
 0x1cc   :  { %827 = vmatprep.subr.mxu0 %v934_v0 }
 0x1cd   :  { %828 = vmatpush3.msra.mxu0 %v429_v38 }
 0x1ce   :  { %829 = vmatprep.subr.mxu0 %v934_v0 }
 0x1cf   :  { %830 = vmatpush3.msra.mxu0 %v428_v39 }
 0x1d0   :  { %831 = vmatprep.subr.mxu0 %v934_v0 }
 0x1d1   :  { %832 = vmatpush3.msra.mxu0 %v427_v40 }
 0x1d2   :  { %833 = vmatprep.subr.mxu0 %v934_v0 }
 0x1d3   :  { %834 = vmatpush3.msra.mxu0 %v426_v41 }
 0x1d4   :  { %835 = vmatprep.subr.mxu0 %v934_v0 }
 0x1d5   :  { %836 = vmatpush3.msra.mxu0 %v425_v59 }
 0x1d6   :  { %837 = vmatprep.subr.mxu0 %v934_v0 }
 0x1d7   :  { %838 = vmatpush3.msra.mxu0 %v424_v60 }
 0x1d8   :  { %839 = vmatprep.subr.mxu0 %v934_v0 }
 0x1d9   :  { %840 = vmatpush3.msra.mxu0 %v423_v61 }
 0x27a   :  { %v322_v49 = vpop.f32.mrf.mxu0 }
 0x27b   :  { %v323_v50 = vadd.f32 %v322_v49, %v249_v47 }
 0x27c   :  { %v324_v51 = vpop.f32.mrf.mxu0 }
 0x27d   :  { %327 = vst [vmem:[%s1098_s4] sm:$0xff] %v323_v50  ;;  %v325_v52 = vadd.f32 %v324_v51, %v253_v48 }
 0x27f   :  { %328 = vst [vmem:[%s1098_s4 + $0x8] sm:$0xff] %v325_v52  ;;  %v330_v53 = vmul.f32 0.5, %v325_v52 }
 0x281   :  { %v331_v54 = vmul.f32 1.442695, %v330_v53 }
 0x283   :  { %885 = vpow2.f32 %v331_v54 }
 0x290   :  { %v886_v56 = vpop.eup %885 }
 0x291   :  { %v333_v57 = vmul.f32 %v886_v56, %v329_v55 }
 0x293   :  { %v334_v58 = vadd.f32 %v333_v57, %v323_v50 }
 0x295   :  { %807 = vmatmul.mubr.f32.vlgmr.msra.gmra.mxu1 %v334_v58 }
 0x296   :  { %876 = vmatprep.mubr.msk.f32.mxu1 %vm935_vm0, %v934_v0  ;;  %845 = vmatpush3.msra.mxu1 %v526_v62 }
 0x297   :  { %846 = vmatprep.subr.mxu1 %v934_v0 }
 0x298   :  { %847 = vmatpush3.msra.mxu1 %v525_v63 }
 0x299   :  { %848 = vmatprep.subr.mxu1 %v934_v0 }
 0x29a   :  { %849 = vmatpush3.msra.mxu1 %v524_v1 }
 0x29b   :  { %850 = vmatprep.subr.mxu1 %v934_v0 }
 0x29c   :  { %851 = vmatpush3.msra.mxu1 %v523_v2 }
 0x29d   :  { %852 = vmatprep.subr.mxu1 %v934_v0 }
 0x29e   :  { %853 = vmatpush3.msra.mxu1 %v522_v3 }
 0x29f   :  { %854 = vmatprep.subr.mxu1 %v934_v0 }
 0x2a0   :  { %855 = vmatpush3.msra.mxu1 %v521_v4 }
 0x2a1   :  { %856 = vmatprep.subr.mxu1 %v934_v0 }
 0x2a2   :  { %857 = vmatpush3.msra.mxu1 %v520_v5 }
 0x2a3   :  { %858 = vmatprep.subr.mxu1 %v934_v0 }
 0x2a4   :  { %859 = vmatpush3.msra.mxu1 %v519_v6 }
 0x2a5   :  { %860 = vmatprep.subr.mxu1 %v934_v0 }
 0x2a6   :  { %861 = vmatpush3.msra.mxu1 %v518_v7 }
 0x2a7   :  { %862 = vmatprep.subr.mxu1 %v934_v0 }
 0x2a8   :  { %863 = vmatpush3.msra.mxu1 %v517_v8 }
 0x2a9   :  { %864 = vmatprep.subr.mxu1 %v934_v0 }
 0x2aa   :  { %865 = vmatpush3.msra.mxu1 %v516_v9 }
 0x2ab   :  { %866 = vmatprep.subr.mxu1 %v934_v0 }
 0x2ac   :  { %867 = vmatpush3.msra.mxu1 %v515_v10 }
 0x2ad   :  { %868 = vmatprep.subr.mxu1 %v934_v0 }
 0x2ae   :  { %869 = vmatpush3.msra.mxu1 %v514_v11 }
 0x2af   :  { %870 = vmatprep.subr.mxu1 %v934_v0 }
 0x2b0   :  { %871 = vmatpush3.msra.mxu1 %v513_v17 }
 0x2b1   :  { %872 = vmatprep.subr.mxu1 %v934_v0 }
 0x2b2   :  { %873 = vmatpush3.msra.mxu1 %v512_v18 }
 0x2b3   :  { %874 = vmatprep.subr.mxu1 %v934_v0 }
 0x2b4   :  { %875 = vmatpush3.msra.mxu1 %v511_v19 }
 0x355   :  { %v418_v13 = vpop.f32.mrf.mxu1 }
 0x356   :  { %v419_v14 = vadd.f32 %v418_v13, %v351_v12 }
 0x357   :  { %v808_v15 = vpop.f32.mrf.mxu1 }
 0x358   :  { %v422_v16 = vmax.f32 %v419_v14, 0.0 }
 0x35a   :  { %842 = vmatmul.mubr.f32.vlgmr.msra.gmra.mxu0 %v422_v16 }
 0x41a   :  { %v506_v21 = vpop.f32.mrf.mxu0 }
 0x41b   :  { %v507_v22 = vadd.f32 %v506_v21, %v439_v20 }
 0x41c   :  { %v843_v23 = vpop.f32.mrf.mxu0 }
 0x41d   :  { %v510_v24 = vmax.f32 %v507_v22, 0.0 }
 0x41f   :  { %877 = vmatmul.mubr.f32.vlgmr.msra.gmra.mxu1 %v510_v24 }
 0x4df   :  { %v594_v26 = vpop.f32.mrf.mxu1 }
 0x4e0   :  { %v595_v27 = vadd.f32 %v594_v26, %v527_v25 }
 0x4e1   :  { %v878_v0 = vpop.f32.mrf.mxu1 }
 0x4e2   :  { %598 = vst [vmem:[#allocation5] sm:$0xff] %v595_v27 }
 0x4e3   :  { %918 = shalt.err (!%p915_p9)
}
 0x4e4   :  { %610 = dma.vmem_to_hbm [thread:$0]  %s608_s17, 128, %s1099_s5, [#allocation4]  }
 0x4e5   :  { %929 = dma.done.wait [#allocation4], 128  }
 0x4e6   :  { %930 = vsyncadd [#allocation4], 4294967168 }
 0x4e7   :  { %616 = vsyncpa [#allocation3], 1 }
 0x4e8   :  { %617 = vsyncpa [#allocation4], 1 }

</bundles_post_ra>
